<compile_context>
chip_gen: v7x
topology: tpu7x:2x2x1
jax: 0.10.0
libtpu: 0.0.40
codegen_flags: <defaults>
</compile_context>

<pallas_src>
import functools

import jax
import jax.numpy as jnp
from jax.experimental import pallas as pl
from jax.experimental.pallas import tpu as pltpu


def _round_up(x, m):
    return ((x + m - 1) // m) * m


def _f1_kernel(pred_ref, target_ref, out_ref, tp_ref, fp_ref, fn_ref, *,
               thresh, eps, n_rows, needs_mask):
    # Grid = (C-blocks [parallel], N-blocks [arbitrary / reduction, LAST]).
    j = pl.program_id(1)

    # Zero the running tp/fp/fn accumulators at the start of each batch sweep.
    @pl.when(j == 0)
    def _():
        tp_ref[...] = jnp.zeros_like(tp_ref)
        fp_ref[...] = jnp.zeros_like(fp_ref)
        fn_ref[...] = jnp.zeros_like(fn_ref)

    pred = pred_ref[...]
    target = target_ref[...]
    tile_n, tile_c = pred.shape

    # Simplified predicates (equivalent to (pred_thresh==target)&(target==1),
    # etc., for the reference's semantics).
    pred_pos = pred > thresh
    pos = target == 1.0
    neg = target == 0.0

    tp_mask = jnp.logical_and(pred_pos, pos)
    fp_mask = jnp.logical_and(pred_pos, neg)
    fn_mask = jnp.logical_and(jnp.logical_not(pred_pos), pos)

    if needs_mask:
        # Mask out padded (out-of-bounds) rows of the last batch tile.
        row = jax.lax.broadcasted_iota(jnp.int32, (tile_n, tile_c), 0)
        valid = (row + j * tile_n) < n_rows
        tp_mask = jnp.logical_and(tp_mask, valid)
        fp_mask = jnp.logical_and(fp_mask, valid)
        fn_mask = jnp.logical_and(fn_mask, valid)

    # Accumulate into 8-sublane accumulators: per-step VPU adds only; the
    # cross-sublane reduction is deferred to the finalize block.
    def partial_sum(mask):
        m = mask.astype(jnp.float32).reshape(tile_n // 8, 8, tile_c)
        return jnp.sum(m, axis=0)

    tp_ref[...] += partial_sum(tp_mask)
    fp_ref[...] += partial_sum(fp_mask)
    fn_ref[...] += partial_sum(fn_mask)

    # Finalize on the last batch tile (eps placement identical to reference).
    @pl.when(j == pl.num_programs(1) - 1)
    def _():
        tp = jnp.sum(tp_ref[...], axis=0, keepdims=True)
        fp = jnp.sum(fp_ref[...], axis=0, keepdims=True)
        fn = jnp.sum(fn_ref[...], axis=0, keepdims=True)
        recall = tp / (fn + tp + eps)
        precision = tp / (fp + tp + eps)
        out_ref[...] = 2.0 * precision * recall / (precision + recall + eps)


def f1_pallas(pred, target, thresh=0.5, eps=1e-5, tile_n=None, tile_c=None):
    """Per-feature F1 score over 2-D (N, C) inputs, reducing over dim 0."""
    N, C = pred.shape

    # Feature (lane) tiling: lane-dense (multiple of 128) blocks when possible;
    # otherwise take the full feature extent (always a legal block shape).
    if tile_c is None:
        if C <= 2048 or C % 128 != 0:
            tile_c = C
        else:
            tile_c = 2048

    # Batch (sublane) tiling: ~2 MiB per input block so DMA/loop overhead is
    # amortized (mem-bound streaming), while 2 inputs x 2 buffers x block plus
    # elementwise temporaries stays comfortably inside v7x's 64 MiB VMEM.
    if tile_n is None:
        budget_bytes = 2 * 1024 * 1024
        rows = budget_bytes // (4 * max(tile_c, 1))
        rows = max(8, min(rows, 4096))
        rows = (rows // 8) * 8
        tile_n = min(_round_up(N, 8), rows)
    assert tile_n % 8 == 0, "batch tile must be a multiple of 8 sublanes"

    needs_mask = (N % tile_n) != 0
    grid = (pl.cdiv(C, tile_c), pl.cdiv(N, tile_n))  # reduction axis LAST

    out = pl.pallas_call(
        functools.partial(_f1_kernel, thresh=float(thresh), eps=float(eps),
                          n_rows=N, needs_mask=needs_mask),
        out_shape=jax.ShapeDtypeStruct((1, C), jnp.float32),
        grid_spec=pltpu.PrefetchScalarGridSpec(
            num_scalar_prefetch=0,
            grid=grid,
            in_specs=[
                pl.BlockSpec((tile_n, tile_c), lambda c, n: (n, c)),
                pl.BlockSpec((tile_n, tile_c), lambda c, n: (n, c)),
            ],
            out_specs=pl.BlockSpec((1, tile_c), lambda c, n: (0, c)),
            scratch_shapes=[
                pltpu.VMEM((8, tile_c), jnp.float32),  # tp accumulator
                pltpu.VMEM((8, tile_c), jnp.float32),  # fp accumulator
                pltpu.VMEM((8, tile_c), jnp.float32),  # fn accumulator
            ],
        ),
        compiler_params=pltpu.CompilerParams(
            # Feature axis shards across TensorCores (v7x megacore); the batch
            # axis carries the accumulator and must stay "arbitrary".
            dimension_semantics=("parallel", "arbitrary"),
            vmem_limit_bytes=64 << 20,
        ),
    )(pred, target)
    return out.reshape(C)


def f1_reference(pred, target, thresh=0.5, eps=1e-5):
    """Pure-JAX reference mirroring the PyTorch forward."""
    pred_thresh = (pred > thresh).astype(jnp.float32)
    eq = pred_thresh == target
    tp = jnp.sum(jnp.logical_and(eq, target == 1.0).astype(jnp.float32), axis=0)
    fp = jnp.sum(jnp.logical_and(~eq, target == 0.0).astype(jnp.float32), axis=0)
    fn = jnp.sum(jnp.logical_and(~eq, target == 1.0).astype(jnp.float32), axis=0)
    recall = tp / (fn + tp + eps)
    precision = tp / (fp + tp + eps)
    return 2.0 * precision * recall / (precision + recall + eps)


def _check(key, N, C, **kwargs):
    k_pred, k_tgt = jax.random.split(key)
    pred = jax.random.uniform(k_pred, (N, C), dtype=jnp.float32)
    target = (jax.random.uniform(k_tgt, (N, C)) > 0.5).astype(jnp.float32)

    out = jax.block_until_ready(f1_pallas(pred, target, **kwargs))
    ref = f1_reference(pred, target)
    assert out.shape == (C,)
    assert jnp.allclose(out, ref, atol=1e-6, rtol=1e-6), (out, ref)
    return out


if __name__ == "__main__":
    key = jax.random.PRNGKey(0)
    k0, k1, k2 = jax.random.split(key, 3)

    # Small, lane-aligned case (single block with the default large tiles).
    _check(k0, N=64, C=128)
    # Multi-batch-tile case with a ragged tail (exercises the row mask).
    _check(k1, N=20, C=128, tile_n=8)
    # Tiled feature axis + multiple batch tiles (exercises the parallel C axis
    # and per-C-block accumulator reset).
    _check(k2, N=24, C=256, tile_n=8, tile_c=128)

    print("KERNEL_OK")
</pallas_src>

<mosaic_0001>
module attributes {stable_mosaic.version = 11 : i64} {
  func.func @_f1_kernel(%arg0: i32, %arg1: i32, %arg2: memref<64x128xf32, #tpu.memory_space<vmem>>, %arg3: memref<64x128xf32, #tpu.memory_space<vmem>>, %arg4: memref<1x128xf32, #tpu.memory_space<vmem>>, %arg5: memref<8x128xf32, #tpu.memory_space<vmem>>, %arg6: memref<8x128xf32, #tpu.memory_space<vmem>>, %arg7: memref<8x128xf32, #tpu.memory_space<vmem>>) attributes {dimension_semantics = [#tpu.dimension_semantics<parallel>, #tpu.dimension_semantics<arbitrary>], iteration_bounds = array<i64: 1, 1>, scalar_prefetch = 0 : i64, scratch_operands = 3 : i64, tpu.core_type = #tpu.core_type<tc>, window_params = [{transform_indices = @transform_0, window_bounds = array<i64: 64, 128>}, {transform_indices = @transform_1, window_bounds = array<i64: 64, 128>}, {transform_indices = @transform_2, window_bounds = array<i64: 1, 128>}]} {
    %c0_i32 = arith.constant 0 : i32
    %0 = arith.cmpi eq, %arg1, %c0_i32 : i32
    %1 = arith.extui %0 : i1 to i32
    %c0_i32_0 = arith.constant 0 : i32
    %2 = arith.cmpi ne, %1, %c0_i32_0 : i32
    scf.if %2 {
      %cst_24 = arith.constant 0.000000e+00 : f32
      %39 = vector.broadcast %cst_24 : f32 to vector<8x128xf32>
      %c0_25 = arith.constant 0 : index
      %c0_26 = arith.constant 0 : index
      %40 = vector.load %arg5[%c0_25, %c0_26] : memref<8x128xf32, #tpu.memory_space<vmem>>, vector<8x128xf32>
      tpu.vector_store %arg5[%c0_25, %c0_26], %39 {strides = array<i32>} : memref<8x128xf32, #tpu.memory_space<vmem>>, vector<8x128xf32>,
      %cst_27 = arith.constant 0.000000e+00 : f32
      %41 = vector.broadcast %cst_27 : f32 to vector<8x128xf32>
      %c0_28 = arith.constant 0 : index
      %c0_29 = arith.constant 0 : index
      %42 = vector.load %arg6[%c0_28, %c0_29] : memref<8x128xf32, #tpu.memory_space<vmem>>, vector<8x128xf32>
      tpu.vector_store %arg6[%c0_28, %c0_29], %41 {strides = array<i32>} : memref<8x128xf32, #tpu.memory_space<vmem>>, vector<8x128xf32>,
      %cst_30 = arith.constant 0.000000e+00 : f32
      %43 = vector.broadcast %cst_30 : f32 to vector<8x128xf32>
      %c0_31 = arith.constant 0 : index
      %c0_32 = arith.constant 0 : index
      %44 = vector.load %arg7[%c0_31, %c0_32] : memref<8x128xf32, #tpu.memory_space<vmem>>, vector<8x128xf32>
      tpu.vector_store %arg7[%c0_31, %c0_32], %43 {strides = array<i32>} : memref<8x128xf32, #tpu.memory_space<vmem>>, vector<8x128xf32>,
    } else {
    }
    %c0 = arith.constant 0 : index
    %c0_1 = arith.constant 0 : index
    %3 = vector.load %arg2[%c0, %c0_1] : memref<64x128xf32, #tpu.memory_space<vmem>>, vector<64x128xf32>
    %c0_2 = arith.constant 0 : index
    %c0_3 = arith.constant 0 : index
    %4 = vector.load %arg3[%c0_2, %c0_3] : memref<64x128xf32, #tpu.memory_space<vmem>>, vector<64x128xf32>
    %cst = arith.constant 5.000000e-01 : f32
    %5 = vector.broadcast %cst : f32 to vector<64x128xf32>
    %6 = arith.cmpf ogt, %3, %5 : vector<64x128xf32>
    %cst_4 = arith.constant 1.000000e+00 : f32
    %7 = vector.broadcast %cst_4 : f32 to vector<64x128xf32>
    %8 = arith.cmpf oeq, %4, %7 : vector<64x128xf32>
    %cst_5 = arith.constant 0.000000e+00 : f32
    %9 = vector.broadcast %cst_5 : f32 to vector<64x128xf32>
    %10 = arith.cmpf oeq, %4, %9 : vector<64x128xf32>
    %11 = arith.andi %6, %8 : vector<64x128xi1>
    %12 = arith.andi %6, %10 : vector<64x128xi1>
    %cst_6 = arith.constant dense<true> : vector<64x128xi1>
    %13 = arith.xori %6, %cst_6 : vector<64x128xi1>
    %14 = arith.andi %13, %8 : vector<64x128xi1>
    %c0_7 = arith.constant 0 : index
    %c0_8 = arith.constant 0 : index
    %15 = vector.load %arg5[%c0_7, %c0_8] : memref<8x128xf32, #tpu.memory_space<vmem>>, vector<8x128xf32>
    %16 = arith.extui %11 : vector<64x128xi1> to vector<64x128xi32>
    %17 = arith.sitofp %16 : vector<64x128xi32> to vector<64x128xf32>
    %18 = vector.shape_cast %17 : vector<64x128xf32> to vector<8x8x128xf32>
    %cst_9 = arith.constant dense<0.000000e+00> : vector<8x128xf32>
    %19 = vector.multi_reduction <add>, %18, %cst_9 [0] : vector<8x8x128xf32> to vector<8x128xf32>
    %20 = arith.addf %15, %19 : vector<8x128xf32>
    %c0_10 = arith.constant 0 : index
    %c0_11 = arith.constant 0 : index
    %21 = vector.load %arg5[%c0_10, %c0_11] : memref<8x128xf32, #tpu.memory_space<vmem>>, vector<8x128xf32>
    tpu.vector_store %arg5[%c0_10, %c0_11], %20 {strides = array<i32>} : memref<8x128xf32, #tpu.memory_space<vmem>>, vector<8x128xf32>,
    %c0_12 = arith.constant 0 : index
    %c0_13 = arith.constant 0 : index
    %22 = vector.load %arg6[%c0_12, %c0_13] : memref<8x128xf32, #tpu.memory_space<vmem>>, vector<8x128xf32>
    %23 = arith.extui %12 : vector<64x128xi1> to vector<64x128xi32>
    %24 = arith.sitofp %23 : vector<64x128xi32> to vector<64x128xf32>
    %25 = vector.shape_cast %24 : vector<64x128xf32> to vector<8x8x128xf32>
    %cst_14 = arith.constant dense<0.000000e+00> : vector<8x128xf32>
    %26 = vector.multi_reduction <add>, %25, %cst_14 [0] : vector<8x8x128xf32> to vector<8x128xf32>
    %27 = arith.addf %22, %26 : vector<8x128xf32>
    %c0_15 = arith.constant 0 : index
    %c0_16 = arith.constant 0 : index
    %28 = vector.load %arg6[%c0_15, %c0_16] : memref<8x128xf32, #tpu.memory_space<vmem>>, vector<8x128xf32>
    tpu.vector_store %arg6[%c0_15, %c0_16], %27 {strides = array<i32>} : memref<8x128xf32, #tpu.memory_space<vmem>>, vector<8x128xf32>,
    %c0_17 = arith.constant 0 : index
    %c0_18 = arith.constant 0 : index
    %29 = vector.load %arg7[%c0_17, %c0_18] : memref<8x128xf32, #tpu.memory_space<vmem>>, vector<8x128xf32>
    %30 = arith.extui %14 : vector<64x128xi1> to vector<64x128xi32>
    %31 = arith.sitofp %30 : vector<64x128xi32> to vector<64x128xf32>
    %32 = vector.shape_cast %31 : vector<64x128xf32> to vector<8x8x128xf32>
    %cst_19 = arith.constant dense<0.000000e+00> : vector<8x128xf32>
    %33 = vector.multi_reduction <add>, %32, %cst_19 [0] : vector<8x8x128xf32> to vector<8x128xf32>
    %34 = arith.addf %29, %33 : vector<8x128xf32>
    %c0_20 = arith.constant 0 : index
    %c0_21 = arith.constant 0 : index
    %35 = vector.load %arg7[%c0_20, %c0_21] : memref<8x128xf32, #tpu.memory_space<vmem>>, vector<8x128xf32>
    tpu.vector_store %arg7[%c0_20, %c0_21], %34 {strides = array<i32>} : memref<8x128xf32, #tpu.memory_space<vmem>>, vector<8x128xf32>,
    %c0_i32_22 = arith.constant 0 : i32
    %36 = arith.cmpi eq, %arg1, %c0_i32_22 : i32
    %37 = arith.extui %36 : i1 to i32
    %c0_i32_23 = arith.constant 0 : i32
    %38 = arith.cmpi ne, %37, %c0_i32_23 : i32
    scf.if %38 {
      %c0_24 = arith.constant 0 : index
      %c0_25 = arith.constant 0 : index
      %39 = vector.load %arg5[%c0_24, %c0_25] : memref<8x128xf32, #tpu.memory_space<vmem>>, vector<8x128xf32>
      %cst_26 = arith.constant dense<0.000000e+00> : vector<128xf32>
      %40 = vector.multi_reduction <add>, %39, %cst_26 [0] : vector<8x128xf32> to vector<128xf32>
      %41 = vector.shape_cast %40 : vector<128xf32> to vector<1x128xf32>
      %c0_27 = arith.constant 0 : index
      %c0_28 = arith.constant 0 : index
      %42 = vector.load %arg6[%c0_27, %c0_28] : memref<8x128xf32, #tpu.memory_space<vmem>>, vector<8x128xf32>
      %cst_29 = arith.constant dense<0.000000e+00> : vector<128xf32>
      %43 = vector.multi_reduction <add>, %42, %cst_29 [0] : vector<8x128xf32> to vector<128xf32>
      %44 = vector.shape_cast %43 : vector<128xf32> to vector<1x128xf32>
      %c0_30 = arith.constant 0 : index
      %c0_31 = arith.constant 0 : index
      %45 = vector.load %arg7[%c0_30, %c0_31] : memref<8x128xf32, #tpu.memory_space<vmem>>, vector<8x128xf32>
      %cst_32 = arith.constant dense<0.000000e+00> : vector<128xf32>
      %46 = vector.multi_reduction <add>, %45, %cst_32 [0] : vector<8x128xf32> to vector<128xf32>
      %47 = vector.shape_cast %46 : vector<128xf32> to vector<1x128xf32>
      %48 = arith.addf %47, %41 : vector<1x128xf32>
      %cst_33 = arith.constant 9.99999974E-6 : f32
      %49 = vector.broadcast %cst_33 : f32 to vector<1x128xf32>
      %50 = arith.addf %48, %49 : vector<1x128xf32>
      %51 = arith.divf %41, %50 : vector<1x128xf32>
      %52 = arith.addf %44, %41 : vector<1x128xf32>
      %cst_34 = arith.constant 9.99999974E-6 : f32
      %53 = vector.broadcast %cst_34 : f32 to vector<1x128xf32>
      %54 = arith.addf %52, %53 : vector<1x128xf32>
      %55 = arith.divf %41, %54 : vector<1x128xf32>
      %cst_35 = arith.constant 2.000000e+00 : f32
      %56 = vector.broadcast %cst_35 : f32 to vector<1x128xf32>
      %57 = arith.mulf %56, %55 : vector<1x128xf32>
      %58 = arith.mulf %57, %51 : vector<1x128xf32>
      %59 = arith.addf %55, %51 : vector<1x128xf32>
      %cst_36 = arith.constant 9.99999974E-6 : f32
      %60 = vector.broadcast %cst_36 : f32 to vector<1x128xf32>
      %61 = arith.addf %59, %60 : vector<1x128xf32>
      %62 = arith.divf %58, %61 : vector<1x128xf32>
      %c0_37 = arith.constant 0 : index
      %c0_38 = arith.constant 0 : index
      %63 = vector.load %arg4[%c0_37, %c0_38] : memref<1x128xf32, #tpu.memory_space<vmem>>, vector<1x128xf32>
      tpu.vector_store %arg4[%c0_37, %c0_38], %62 {strides = array<i32>} : memref<1x128xf32, #tpu.memory_space<vmem>>, vector<1x128xf32>,
    } else {
    }
    return
  }
  func.func @transform_0(%arg0: i32, %arg1: i32) -> (i32, i32) {
    %c0_i32 = arith.constant 0 : i32
    return %arg1, %arg0 : i32, i32
  }
  func.func @transform_1(%arg0: i32, %arg1: i32) -> (i32, i32) {
    %c0_i32 = arith.constant 0 : i32
    return %arg1, %arg0 : i32, i32
  }
  func.func @transform_2(%arg0: i32, %arg1: i32) -> (i32, i32) {
    %c0_i32 = arith.constant 0 : i32
    %c0_i32_0 = arith.constant 0 : i32
    return %c0_i32, %arg0 : i32, i32
  }
}

</mosaic_0001>

<bundles_post_ra>
// kernel: tpu_custom_call.1
= control target key start
LH: loop header
LB: loop body
LE: loop exit
PB: predicated region body
PF: predicated region fallthrough
CT: control target
= control target key end

     0   :  { %7 = vsyncpa [#allocation6], 0  ;;  %s635_s0 = inlined_call_operand.hbm [shape: f32[64,128], index: 0, kind: input, shape index: {}]   ;;  %s636_s1 = inlined_call_operand.hbm [shape: f32[64,128], index: 1, kind: input, shape index: {}]   ;;  %s637_s2 = inlined_call_operand.hbm [shape: f32[1,128], index: 2, kind: output, shape index: {}]  }
   0x1   :  { %8 = vsyncpa [#allocation9], 0 }
   0x2   :  { %9 = vsyncpa [#allocation7], 0  ;;  %s361_s9 = smov [#allocation5]   ;;  %s289_s13 = scalar_lea.hbm %s635_s0, 1024 }
   0x3   :  { %s15_s10 = sshll.u32 %s361_s9, 4  ;;  %p290_p0 = scmp.ne.s32.totalorder %s635_s0, %s289_s13  ;;  %s16_s10 = int_to_ptr.vmem [resolvable:$true] %s15_s10 }
   0x4   :  { %p293_p1 = scmp.lt.u32.totalorder %s289_s13, %s635_s0 }
   0x6   :  { %p295_p2 = pnand %p293_p1, %p290_p0 }
   0x8   :  { %298 = shalt.err (!%p295_p2)
}
   0x9   :  { %s299_s18 = scalar_lea.vmem %s16_s10, 1024  ;;  %p304_p4 = scmp.lt.s32.totalorder %s16_s10, %s16_s10 }
   0xa   :  { %p300_p3 = scmp.ne.s32.totalorder %s16_s10, %s299_s18  ;;  %p305_p5 = scmp.lt.s32.totalorder %s299_s18, %s299_s18 }
   0xc   :  { %p306_p6 = por %p305_p5, %p304_p4 }
   0xe   :  { %p307_p7 = pnand %p306_p6, %p300_p3 }
  0x10   :  { %310 = shalt.err (!%p307_p7)
}
  0x11   :  { %s362_s19 = smov 128   ;;  %s363_s20 = smov 8  }
  0x12   :  { %21 = dma.hbm_to_vmem [thread:$0]  %s635_s0, 1024, %s16_s10, [#allocation6], %s362_s19, %s362_s19, %s363_s20  }
  0x13   :  { %s364_s23 = smov [#allocation8]   ;;  %s311_s27 = scalar_lea.hbm %s636_s1, 1024 }
  0x14   :  { %s27_s24 = sshll.u32 %s364_s23, 4  ;;  %p312_p8 = scmp.ne.s32.totalorder %s636_s1, %s311_s27  ;;  %s28_s24 = int_to_ptr.vmem [resolvable:$true] %s27_s24 }
  0x15   :  { %p315_p9 = scmp.lt.u32.totalorder %s311_s27, %s636_s1 }
  0x17   :  { %p317_p10 = pnand %p315_p9, %p312_p8 }
  0x19   :  { %320 = shalt.err (!%p317_p10)
}
  0x1a   :  { %s321_s4 = scalar_lea.vmem %s28_s24, 1024  ;;  %p326_p12 = scmp.lt.s32.totalorder %s28_s24, %s28_s24 }
  0x1b   :  { %p322_p11 = scmp.ne.s32.totalorder %s28_s24, %s321_s4  ;;  %p327_p13 = scmp.lt.s32.totalorder %s321_s4, %s321_s4 }
  0x1d   :  { %p328_p0 = por %p327_p13, %p326_p12 }
  0x1f   :  { %p329_p1 = pnand %p328_p0, %p322_p11 }
  0x21   :  { %332 = shalt.err (!%p329_p1)
}
  0x22   :  { %33 = dma.hbm_to_vmem [thread:$0]  %s636_s1, 1024, %s28_s24, [#allocation9], %s362_s19, %s362_s19, %s363_s20  }
  0x23   :  { %355 = dma.done.wait [#allocation6], 1024  }
  0x24   :  { %356 = vsyncadd [#allocation6], 4294966272 }
  0x25   :  { %357 = dma.done.wait [#allocation9], 1024  }
  0x26   :  { %358 = vsyncadd [#allocation9], 4294966272  ;;  %v407_v0 = vld [vmem:[#allocation5] sm:$0xff]  ;;  %v409_v1 = vld [vmem:[#allocation5 + $0x8] sm:$0xff]  ;;  %v365_v16 = vmov 0.0   ;;  %s367_s1 = smov [#allocation10]  }
  0x27   :  { %v411_v2 = vld [vmem:[#allocation5 + $0x10] sm:$0xff]  ;;  %v413_v3 = vld [vmem:[#allocation5 + $0x18] sm:$0xff]  ;;  %v415_v4 = vld [vmem:[#allocation5 + $0x20] sm:$0xff]  ;;  %vm639_vm0 = vcmp.gt.f32.partialorder %v407_v0, 0.5  ;;  %vm641_vm1 = vcmp.gt.f32.partialorder %v409_v1, 0.5  ;;  %s242_s6 = sshll.u32 %s367_s1, 4  ;;  %s243_s6 = int_to_ptr.vmem [resolvable:$true] %s242_s6 }
  0x28   :  { %v417_v5 = vld [vmem:[#allocation5 + $0x28] sm:$0xff]  ;;  %v419_v6 = vld [vmem:[#allocation8] sm:$0xff]  ;;  %v424_v8 = vld [vmem:[#allocation8 + $0x10] sm:$0xff]  ;;  %vm643_vm3 = vcmp.gt.f32.partialorder %v411_v2, 0.5  ;;  %vm66_vm6 = vcmp.gt.f32.partialorder %v413_v3, 0.5  ;;  %vm650_vm9 = vcmp.gt.f32.partialorder %v415_v4, 0.5  ;;  %p338_p3 = scmp.lt.s32.totalorder %s243_s6, %s243_s6 }
  0x29   :  { %v422_v7 = vld [vmem:[#allocation8 + $0x8] sm:$0xff]  ;;  %v426_v9 = vld [vmem:[#allocation8 + $0x18] sm:$0xff]  ;;  %vm638_vm2 = vcmp.eq.f32.partialorder %v419_v6, 1.0  ;;  %v430_v10 = vld [vmem:[#allocation5 + $0x30] sm:$0xff]  ;;  %vm642_vm5 = vcmp.eq.f32.partialorder %v424_v8, 1.0  ;;  %vm649_vm12 = vcmp.gt.f32.partialorder %v417_v5, 0.5 }
  0x2a   :  { %v432_v11 = vld [vmem:[#allocation8 + $0x20] sm:$0xff]  ;;  %v434_v12 = vld [vmem:[#allocation8 + $0x28] sm:$0xff]  ;;  %vm640_vm4 = vcmp.eq.f32.partialorder %v422_v7, 1.0  ;;  %v439_v13 = vld [vmem:[#allocation8 + $0x30] sm:$0xff]  ;;  %vm647_vm7 = vcmp.eq.f32.partialorder %v426_v9, 1.0  ;;  %vm648_vm13 = vcmp.gt.f32.partialorder %v430_v10, 0.5 }
  0x2b   :  { %vm87_vm8 = vmand %vm639_vm0, %vm638_vm2  ;;  %v447_v14 = vld [vmem:[#allocation5 + $0x38] sm:$0xff]  ;;  %vm644_vm10 = vcmp.eq.f32.partialorder %v432_v11, 1.0  ;;  %vm645_vm14 = vcmp.eq.f32.partialorder %v434_v12, 1.0  ;;  %vm646_vm2 = vcmp.eq.f32.partialorder %v439_v13, 1.0  ;;  %s333_s7 = scalar_lea.vmem %s243_s6, 16  ;;  %s337_s8 = scalar_lea.vmem %s243_s6, 32 }
  0x2c   :  { %v449_v15 = vld [vmem:[#allocation8 + $0x38] sm:$0xff]  ;;  %vm88_vm11 = vmand %vm641_vm1, %vm640_vm4  ;;  %v252_v17 = vsel %vm87_vm8, 1.0, %v365_v16  ;;  %vm652_vm4 = vcmp.gt.f32.partialorder %v447_v14, 0.5  ;;  %p334_p2 = scmp.ne.s32.totalorder %s243_s6, %s333_s7  ;;  %p339_p4 = scmp.lt.s32.totalorder %s337_s8, %s333_s7 }
  0x2d   :  { %vm89_vm15 = vmand %vm643_vm3, %vm642_vm5  ;;  %v253_v18 = vsel %vm88_vm11, 1.0, %v365_v16  ;;  %vm651_vm1 = vcmp.eq.f32.partialorder %v449_v15, 1.0  ;;  %vm79_vm3 = vcmp.eq.f32.partialorder %v419_v6, 0.0  ;;  %vm80_vm11 = vcmp.eq.f32.partialorder %v422_v7, 0.0 }
  0x2e   :  { %vm90_vm0 = vmand %vm66_vm6, %vm647_vm7  ;;  %v254_v19 = vsel %vm89_vm15, 1.0, %v365_v16  ;;  %v136_v20 = vadd.f32 %v253_v18, %v252_v17  ;;  %p340_p5 = por %p339_p4, %p338_p3 }
  0x2f   :  { %vm91_vm5 = vmand %vm650_vm9, %vm644_vm10  ;;  %v255_v21 = vsel %vm90_vm0, 1.0, %v365_v16  ;;  %vm81_vm10 = vcmp.eq.f32.partialorder %v424_v8, 0.0  ;;  %vm82_vm0 = vcmp.eq.f32.partialorder %v426_v9, 0.0 }
  0x30   :  { %vm92_vm8 = vmand %vm649_vm12, %vm645_vm14  ;;  %v137_v23 = vadd.f32 %v254_v19, %v136_v20  ;;  %v256_v25 = vsel %vm91_vm5, 1.0, %v365_v16  ;;  %vm658_vm12 = vcmp.gt.f32.partialorder %v409_v1, 0.5  ;;  %p341_p6 = pnand %p340_p5, %p334_p2 }
  0x31   :  { %vm489_vm15 = vmand %vm648_vm13, %vm646_vm2  ;;  %vm657_vm2 = vcmp.gt.f32.partialorder %v407_v0, 0.5  ;;  %vm83_vm13 = vcmp.eq.f32.partialorder %v432_v11, 0.0  ;;  %v257_v27 = vsel %vm92_vm8, 1.0, %v365_v16  ;;  %vm662_vm8 = vcmp.gt.f32.partialorder %v430_v10, 0.5 }
  0x32   :  { %vm498_vm14 = vmand %vm652_vm4, %vm651_vm1  ;;  %v138_v26 = vadd.f32 %v255_v21, %v137_v23  ;;  %vm84_vm1 = vcmp.eq.f32.partialorder %v434_v12, 0.0  ;;  %vm659_vm4 = vcmp.gt.f32.partialorder %v411_v2, 0.5  ;;  %v258_v31 = vsel %vm489_vm15, 1.0, %v365_v16 }
  0x33   :  { %vm95_vm7 = vmand %vm657_vm2, %vm79_vm3  ;;  %vm85_vm3 = vcmp.eq.f32.partialorder %v439_v13, 0.0  ;;  %v259_v37 = vsel %vm498_vm14, 1.0, %v365_v16  ;;  %vm667_vm14 = vcmp.gt.f32.partialorder %v409_v1, 0.5 }
  0x34   :  { %vm96_vm9 = vmand %vm658_vm12, %vm80_vm11  ;;  %v260_v28 = vsel %vm95_vm7, 1.0, %v365_v16  ;;  %v139_v29 = vadd.f32 %v256_v25, %v138_v26  ;;  %vm660_vm7 = vcmp.gt.f32.partialorder %v415_v4, 0.5 }
  0x35   :  { %vm97_vm5 = vmand %vm659_vm4, %vm81_vm10  ;;  %v261_v30 = vsel %vm96_vm9, 1.0, %v365_v16  ;;  %vm86_vm4 = vcmp.eq.f32.partialorder %v449_v15, 0.0  ;;  %vm661_vm9 = vcmp.gt.f32.partialorder %v417_v5, 0.5 }
  0x36   :  { %vm98_vm2 = vmand %vm66_vm6, %vm82_vm0  ;;  %v262_v32 = vsel %vm97_vm5, 1.0, %v365_v16  ;;  %v162_v33 = vadd.f32 %v261_v30, %v260_v28  ;;  %v140_v34 = vadd.f32 %v257_v27, %v139_v29  ;;  %vm366_vm0 = vmmov 1  }
  0x37   :  { %vm99_vm12 = vmand %vm660_vm7, %vm83_vm13  ;;  %v263_v35 = vsel %vm98_vm2, 1.0, %v365_v16  ;;  %vm663_vm13 = vcmp.gt.f32.partialorder %v447_v14, 0.5 }
  0x38   :  { %vm100_vm10 = vmand %vm661_vm9, %vm84_vm1  ;;  %v163_v36 = vadd.f32 %v262_v32, %v162_v33  ;;  %v141_v38 = vadd.f32 %v258_v31, %v140_v34  ;;  %v264_v39 = vsel %vm99_vm12, 1.0, %v365_v16  ;;  %vm664_vm1 = vcmp.gt.f32.partialorder %v407_v0, 0.5 }
  0x39   :  { %vm101_vm11 = vmand %vm662_vm8, %vm85_vm3  ;;  %v265_v41 = vsel %vm100_vm10, 1.0, %v365_v16  ;;  %vm668_vm3 = vcmp.gt.f32.partialorder %v411_v2, 0.5  ;;  %vm676_vm10 = vcmp.gt.f32.partialorder %v417_v5, 0.5 }
  0x3a   :  { %v164_v40 = vadd.f32 %v263_v35, %v163_v36  ;;  %vm102_vm15 = vmand %vm663_vm13, %vm86_vm4  ;;  %v142_v43 = vadd.f32 %v259_v37, %v141_v38  ;;  %v266_v45 = vsel %vm101_vm11, 1.0, %v365_v16  ;;  %vm673_vm4 = vcmp.gt.f32.partialorder %v415_v4, 0.5 }
  0x3b   :  { %vm540_vm5 = vmxor %vm664_vm1, %vm366_vm0  ;;  %v267_v49 = vsel %vm102_vm15, 1.0, %v365_v16  ;;  %vm682_vm13 = vcmp.eq.f32.partialorder %v419_v6, 1.0  ;;  %vm683_vm1 = vcmp.eq.f32.partialorder %v422_v7, 1.0 }
  0x3c   :  { %v165_v44 = vadd.f32 %v264_v39, %v164_v40  ;;  %vm104_vm2 = vmxor %vm667_vm14, %vm366_vm0  ;;  %v201_v52 = vrot.slane %v142_v43, 4 }
  0x3d   :  { %vm551_vm7 = vmxor %vm668_vm3, %vm366_vm0  ;;  %vm684_vm3 = vcmp.eq.f32.partialorder %v424_v8, 1.0 }
  0x3e   :  { %v166_v47 = vadd.f32 %v265_v41, %v165_v44  ;;  %vm558_vm12 = vmxor %vm66_vm6, %vm366_vm0  ;;  %vm679_vm6 = vcmp.gt.f32.partialorder %v430_v10, 0.5  ;;  %v202_v57 = vadd.f32 %v201_v52, %v142_v43 }
  0x3f   :  { %vm566_vm9 = vmxor %vm673_vm4, %vm366_vm0 }
  0x40   :  { %v167_v51 = vadd.f32 %v266_v45, %v166_v47  ;;  %vm573_vm8 = vmxor %vm676_vm10, %vm366_vm0  ;;  %vm685_vm10 = vcmp.eq.f32.partialorder %v426_v9, 1.0  ;;  %v203_v1 = vrot.slane %v202_v57, 2 }
  0x41   :  { %vm580_vm11 = vmxor %vm679_vm6, %vm366_vm0 }
  0x42   :  { %v168_v55 = vadd.f32 %v267_v49, %v167_v51  ;;  %vm111_vm15 = vmand %vm540_vm5, %vm682_vm13  ;;  %vm686_vm5 = vcmp.eq.f32.partialorder %v432_v11, 1.0  ;;  %v204_v7 = vadd.f32 %v203_v1, %v202_v57 }
  0x43   :  { %vm112_vm14 = vmand %vm104_vm2, %vm683_vm1  ;;  %v268_v56 = vsel %vm111_vm15, 1.0, %v365_v16  ;;  %vm689_vm1 = vcmp.eq.f32.partialorder %v439_v13, 1.0 }
  0x44   :  { %v208_v58 = vrot.slane %v168_v55, 4  ;;  %vm113_vm4 = vmand %vm551_vm7, %vm684_vm3  ;;  %v269_v59 = vsel %vm112_vm14, 1.0, %v365_v16  ;;  %vm687_vm7 = vcmp.eq.f32.partialorder %v434_v12, 1.0  ;;  %vm690_vm14 = vcmp.eq.f32.partialorder %v449_v15, 1.0 }
  0x45   :  { %vm114_vm6 = vmand %vm558_vm12, %vm685_vm10  ;;  %v270_v60 = vsel %vm113_vm4, 1.0, %v365_v16  ;;  %v188_v61 = vadd.f32 %v269_v59, %v268_v56  ;;  %vm688_vm12 = vcmp.gt.f32.partialorder %v447_v14, 0.5  ;;  %v205_v14 = vrot.slane %v204_v7, 1 }
  0x46   :  { %v209_v62 = vadd.f32 %v208_v58, %v168_v55  ;;  %vm115_vm2 = vmand %vm566_vm9, %vm686_vm5  ;;  %v271_v63 = vsel %vm114_vm6, 1.0, %v365_v16 }
  0x47   :  { %vm116_vm13 = vmand %vm573_vm8, %vm687_vm7  ;;  %v189_v0 = vadd.f32 %v270_v60, %v188_v61  ;;  %v272_v3 = vsel %vm115_vm2, 1.0, %v365_v16  ;;  %v206_v18 = vadd.f32 %v205_v14, %v204_v7 }
  0x48   :  { %v210_v2 = vrot.slane %v209_v62, 2  ;;  %vm110_vm15 = vmxor %vm688_vm12, %vm366_vm0  ;;  %v273_v5 = vsel %vm116_vm13, 1.0, %v365_v16 }
  0x49   :  { %vm117_vm9 = vmand %vm580_vm11, %vm689_vm1  ;;  %v190_v4 = vadd.f32 %v271_v63, %v189_v0 }
  0x4a   :  { %vm118_vm8 = vmand %vm110_vm15, %vm690_vm14  ;;  %v211_v8 = vadd.f32 %v210_v2, %v209_v62  ;;  %v274_v9 = vsel %vm117_vm9, 1.0, %v365_v16 }
  0x4b   :  { %v191_v6 = vadd.f32 %v272_v3, %v190_v4  ;;  %v275_v11 = vsel %vm118_vm8, 1.0, %v365_v16 }
  0x4c   :  { %v212_v13 = vrot.slane %v211_v8, 1 }
  0x4d   :  { %v192_v10 = vadd.f32 %v273_v5, %v191_v6 }
  0x4e   :  { %v213_v19 = vadd.f32 %v212_v13, %v211_v8 }
  0x4f   :  { %v193_v12 = vadd.f32 %v274_v9, %v192_v10 }
  0x50   :  { %v225_v23 = vadd.f32 %v213_v19, %v206_v18 }
  0x51   :  { %v194_v17 = vadd.f32 %v275_v11, %v193_v12 }
  0x52   :  { %v226_v25 = vadd.f32 1e-05, %v225_v23 }
  0x53   :  { %v215_v20 = vrot.slane %v194_v17, 4 }
  0x54   :  { %283 = vrcp.f32 %v226_v25 }
  0x55   :  { %v216_v21 = vadd.f32 %v215_v20, %v194_v17 }
  0x57   :  { %v217_v22 = vrot.slane %v216_v21, 2 }
  0x59   :  { %v218_v15 = vadd.f32 %v217_v22, %v216_v21 }
  0x5b   :  { %v219_v24 = vrot.slane %v218_v15, 1 }
  0x5d   :  { %v220_v26 = vadd.f32 %v219_v24, %v218_v15 }
  0x5e   :  { %v284_v29 = vpop.eup %283 }
  0x5f   :  { %v221_v27 = vadd.f32 %v220_v26, %v206_v18  ;;  %v228_v16 = vmul.f32 %v284_v29, %v206_v18 }
  0x61   :  { %v222_v28 = vadd.f32 1e-05, %v221_v27  ;;  %v229_v34 = vmul.f32 2.0, %v228_v16 }
  0x63   :  { %285 = vrcp.f32 %v222_v28 }
  0x6d   :  { %v286_v30 = vpop.eup %285 }
  0x6e   :  { %v224_v31 = vmul.f32 %v286_v30, %v206_v18 }
  0x70   :  { %v231_v32 = vadd.f32 %v228_v16, %v224_v31  ;;  %v230_v35 = vmul.f32 %v229_v34, %v224_v31 }
  0x72   :  { %v232_v33 = vadd.f32 1e-05, %v231_v32 }
  0x74   :  { %287 = vrcp.f32 %v232_v33 }
  0x7e   :  { %v288_v36 = vpop.eup %287 }
  0x7f   :  { %v234_v37 = vmul.f32 %v288_v36, %v230_v35 }
  0x81   :  { %235 = vst [vmem:[#allocation10] sm:$0x1] %v234_v37 }
  0x82   :  { %344 = shalt.err (!%p341_p6)
}
  0x83   :  { %s345_s11 = scalar_lea.hbm %s637_s2, 16 }
  0x84   :  { %p346_p7 = scmp.ne.s32.totalorder %s637_s2, %s345_s11  ;;  %p349_p8 = scmp.lt.u32.totalorder %s345_s11, %s637_s2 }
  0x86   :  { %p351_p9 = pnand %p349_p8, %p346_p7 }
  0x88   :  { %354 = shalt.err (!%p351_p9)
}
  0x89   :  { %245 = dma.vmem_to_hbm [thread:$0]  %s243_s6, 16, %s637_s2, [#allocation7]  }
  0x8a   :  { %359 = dma.done.wait [#allocation7], 16  }
  0x8b   :  { %360 = vsyncadd [#allocation7], 4294967280 }
  0x8c   :  { %249 = vsyncpa [#allocation6], 1 }
  0x8d   :  { %250 = vsyncpa [#allocation9], 1 }
  0x8e   :  { %251 = vsyncpa [#allocation7], 1 }

</bundles_post_ra>
